<compile_context>
chip_gen: v7x
topology: tpu7x:2x2x1
jax: 0.10.0
libtpu: 0.0.40
codegen_flags: <defaults>
</compile_context>

<pallas_src>
import functools

import jax
import jax.numpy as jnp
from jax.experimental import pallas as pl
from jax.experimental.pallas import tpu as pltpu


def _bin_bounds(idx, in_size, out_size):
    """PyTorch adaptive pooling bin boundaries (static Python ints)."""
    start = (idx * in_size) // out_size
    end = -((-(idx + 1) * in_size) // out_size)  # ceil((idx+1)*in/out)
    return start, end


def _gmp_kernel(x_ref, o_ref, *, h_out, w_out):
    # x_ref: (1, H_in, W_in, C_tile) VMEM tile (NHWC, C on lanes)
    # o_ref: (1, H_out, W_out, C_tile) VMEM tile (NHWC output)
    _, h_in, w_in, _ = x_ref.shape

    # Compute in f32 for floating inputs (max is exact; avoids per-op bf16 promotion
    # on chips without native bf16 VPU, e.g. v5e). Integer dtypes stay as-is.
    if jnp.issubdtype(o_ref.dtype, jnp.floating):
        cdtype = jnp.float32
    else:
        cdtype = o_ref.dtype

    for i in range(h_out):
        hs, he = _bin_bounds(i, h_in, h_out)
        # Stage 1: reduce the H rows of this bin into a (W_in, C_tile) slab with
        # pure element-wise maxima (VPU); rows are loaded via Ref slices only.
        slab = x_ref[0, hs, :, :].astype(cdtype)
        for h in range(hs + 1, he):
            slab = jnp.maximum(slab, x_ref[0, h, :, :].astype(cdtype))

        for j in range(w_out):
            ws, we = _bin_bounds(j, w_in, w_out)
            # Stage 2: element-wise max chain over the W rows of this bin.
            v = slab[ws:ws + 1, :]                        # (1, C_tile)
            for w in range(ws + 1, we):
                v = jnp.maximum(v, slab[w:w + 1, :])
            # Write straight into the output tile (lane-dense when C_tile % 128 == 0).
            o_ref[0, i, j:j + 1, :] = v.astype(o_ref.dtype)


def _choose_c_tile(c, h_in, w_in, itemsize, budget_bytes=8 * 1024 * 1024):
    """Largest 128-multiple divisor of C whose input block fits the VMEM budget."""
    if c % 128 != 0:
        # Full-dim block is always legal w.r.t. the (8,128) BlockSpec constraint.
        return c
    best = 128
    t = 128
    while t <= c:
        if c % t == 0 and h_in * w_in * t * itemsize <= budget_bytes:
            best = t
        t += 128
    return best


def gmp_forward(x, h_out, w_out):
    """x: (N, C, H_in, W_in) NCHW -> (N, H_out, W_out, C) NHWC adaptive max pool."""
    n, c, h_in, w_in = x.shape

    # Layout plumbing (wrapper-side, plain XLA): put C on the lane axis for the kernel.
    x_nhwc = jnp.transpose(x, (0, 2, 3, 1))  # (N, H_in, W_in, C)

    tc = _choose_c_tile(c, h_in, w_in, jnp.dtype(x.dtype).itemsize)
    kernel = functools.partial(_gmp_kernel, h_out=h_out, w_out=w_out)

    return pl.pallas_call(
        kernel,
        out_shape=jax.ShapeDtypeStruct((n, h_out, w_out, c), x.dtype),
        grid_spec=pltpu.PrefetchScalarGridSpec(
            num_scalar_prefetch=0,
            grid=(n, c // tc),  # pooling is per-channel: both axes fully parallel
            in_specs=[
                pl.BlockSpec((1, h_in, w_in, tc), lambda b, ci: (b, 0, 0, ci)),
            ],
            out_specs=pl.BlockSpec((1, h_out, w_out, tc), lambda b, ci: (b, 0, 0, ci)),
        ),
        compiler_params=pltpu.CompilerParams(
            dimension_semantics=("parallel", "parallel"),
            vmem_limit_bytes=32 * 1024 * 1024,  # safe on v5e/v6e/v7x; blocks sized <= ~8 MiB
        ),
    )(x_nhwc)


def _gmp_reference(x, h_out, w_out):
    """Pure-JAX reference with PyTorch AdaptiveMaxPool2d semantics + NHWC permute."""
    n, c, h_in, w_in = x.shape
    out = jnp.zeros((n, h_out, w_out, c), dtype=x.dtype)
    for i in range(h_out):
        hs, he = _bin_bounds(i, h_in, h_out)
        for j in range(w_out):
            ws, we = _bin_bounds(j, w_in, w_out)
            out = out.at[:, i, j, :].set(jnp.max(x[:, :, hs:he, ws:we], axis=(2, 3)))
    return out


if __name__ == "__main__":
    key = jax.random.PRNGKey(0)

    # Case 1: small shapes consistent with the module's forward (NCHW conv-style input),
    # non-divisible output size exercises adaptive binning; C < 128 -> full-C block path.
    N, C, H_IN, W_IN = 2, 4, 16, 16
    H_OUT, W_OUT = 5, 3
    x = jax.random.normal(key, (N, C, H_IN, W_IN), dtype=jnp.float32)

    out = gmp_forward(x, H_OUT, W_OUT)
    out = jax.block_until_ready(out)
    ref = _gmp_reference(x, H_OUT, W_OUT)
    assert out.shape == (N, H_OUT, W_OUT, C), out.shape
    assert jnp.allclose(out, ref), "Pallas GMP mismatch vs reference (case 1)"

    # Case 2: lane-dense path (C a multiple of 128 -> C-tiled grid, unmasked stores).
    key2 = jax.random.PRNGKey(1)
    N2, C2, H2, W2 = 2, 256, 8, 8
    H_OUT2, W_OUT2 = 3, 3
    x2 = jax.random.normal(key2, (N2, C2, H2, W2), dtype=jnp.float32)

    out2 = gmp_forward(x2, H_OUT2, W_OUT2)
    out2 = jax.block_until_ready(out2)
    ref2 = _gmp_reference(x2, H_OUT2, W_OUT2)
    assert out2.shape == (N2, H_OUT2, W_OUT2, C2), out2.shape
    assert jnp.allclose(out2, ref2), "Pallas GMP mismatch vs reference (case 2)"

    print("KERNEL_OK")
</pallas_src>

<mosaic_0001>
module attributes {stable_mosaic.version = 11 : i64} {
  func.func @_gmp_kernel(%arg0: i32, %arg1: i32, %arg2: memref<1x16x16x4xf32, #tpu.memory_space<vmem>>, %arg3: memref<1x5x3x4xf32, #tpu.memory_space<vmem>>) attributes {dimension_semantics = [#tpu.dimension_semantics<parallel>, #tpu.dimension_semantics<parallel>], iteration_bounds = array<i64: 2, 1>, scalar_prefetch = 0 : i64, scratch_operands = 0 : i64, tpu.core_type = #tpu.core_type<tc>, window_params = [{transform_indices = @transform_0, window_bounds = array<i64: 1, 16, 16, 4>}, {transform_indices = @transform_1, window_bounds = array<i64: 1, 5, 3, 4>}]} {
    %c0 = arith.constant 0 : index
    %c0_0 = arith.constant 0 : index
    %c0_1 = arith.constant 0 : index
    %c0_2 = arith.constant 0 : index
    %0 = vector.load %arg2[%c0, %c0_0, %c0_1, %c0_2] : memref<1x16x16x4xf32, #tpu.memory_space<vmem>>, vector<1x1x16x4xf32>
    %1 = vector.shape_cast %0 : vector<1x1x16x4xf32> to vector<16x4xf32>
    %c0_3 = arith.constant 0 : index
    %c1 = arith.constant 1 : index
    %c0_4 = arith.constant 0 : index
    %c0_5 = arith.constant 0 : index
    %2 = vector.load %arg2[%c0_3, %c1, %c0_4, %c0_5] : memref<1x16x16x4xf32, #tpu.memory_space<vmem>>, vector<1x1x16x4xf32>
    %3 = vector.shape_cast %2 : vector<1x1x16x4xf32> to vector<16x4xf32>
    %4 = arith.maximumf %1, %3 : vector<16x4xf32>
    %c0_6 = arith.constant 0 : index
    %c2 = arith.constant 2 : index
    %c0_7 = arith.constant 0 : index
    %c0_8 = arith.constant 0 : index
    %5 = vector.load %arg2[%c0_6, %c2, %c0_7, %c0_8] : memref<1x16x16x4xf32, #tpu.memory_space<vmem>>, vector<1x1x16x4xf32>
    %6 = vector.shape_cast %5 : vector<1x1x16x4xf32> to vector<16x4xf32>
    %7 = arith.maximumf %4, %6 : vector<16x4xf32>
    %c0_9 = arith.constant 0 : index
    %c3 = arith.constant 3 : index
    %c0_10 = arith.constant 0 : index
    %c0_11 = arith.constant 0 : index
    %8 = vector.load %arg2[%c0_9, %c3, %c0_10, %c0_11] : memref<1x16x16x4xf32, #tpu.memory_space<vmem>>, vector<1x1x16x4xf32>
    %9 = vector.shape_cast %8 : vector<1x1x16x4xf32> to vector<16x4xf32>
    %10 = arith.maximumf %7, %9 : vector<16x4xf32>
    %11 = vector.extract_strided_slice %10 {offsets = [0, 0], sizes = [1, 4], strides = [1, 1]} : vector<16x4xf32> to vector<1x4xf32>
    %12 = vector.extract_strided_slice %10 {offsets = [1, 0], sizes = [1, 4], strides = [1, 1]} : vector<16x4xf32> to vector<1x4xf32>
    %13 = arith.maximumf %11, %12 : vector<1x4xf32>
    %14 = vector.extract_strided_slice %10 {offsets = [2, 0], sizes = [1, 4], strides = [1, 1]} : vector<16x4xf32> to vector<1x4xf32>
    %15 = arith.maximumf %13, %14 : vector<1x4xf32>
    %16 = vector.extract_strided_slice %10 {offsets = [3, 0], sizes = [1, 4], strides = [1, 1]} : vector<16x4xf32> to vector<1x4xf32>
    %17 = arith.maximumf %15, %16 : vector<1x4xf32>
    %18 = vector.extract_strided_slice %10 {offsets = [4, 0], sizes = [1, 4], strides = [1, 1]} : vector<16x4xf32> to vector<1x4xf32>
    %19 = arith.maximumf %17, %18 : vector<1x4xf32>
    %20 = vector.extract_strided_slice %10 {offsets = [5, 0], sizes = [1, 4], strides = [1, 1]} : vector<16x4xf32> to vector<1x4xf32>
    %21 = arith.maximumf %19, %20 : vector<1x4xf32>
    %c0_12 = arith.constant 0 : index
    %c0_13 = arith.constant 0 : index
    %c0_14 = arith.constant 0 : index
    %c0_15 = arith.constant 0 : index
    %22 = vector.load %arg3[%c0_12, %c0_13, %c0_14, %c0_15] : memref<1x5x3x4xf32, #tpu.memory_space<vmem>>, vector<1x1x1x4xf32>
    %23 = vector.shape_cast %22 : vector<1x1x1x4xf32> to vector<1x4xf32>
    %24 = vector.shape_cast %21 : vector<1x4xf32> to vector<1x1x1x4xf32>
    tpu.vector_store %arg3[%c0_12, %c0_13, %c0_14, %c0_15], %24 {strides = array<i32>} : memref<1x5x3x4xf32, #tpu.memory_space<vmem>>, vector<1x1x1x4xf32>,
    %25 = vector.extract_strided_slice %10 {offsets = [5, 0], sizes = [1, 4], strides = [1, 1]} : vector<16x4xf32> to vector<1x4xf32>
    %26 = vector.extract_strided_slice %10 {offsets = [6, 0], sizes = [1, 4], strides = [1, 1]} : vector<16x4xf32> to vector<1x4xf32>
    %27 = arith.maximumf %25, %26 : vector<1x4xf32>
    %28 = vector.extract_strided_slice %10 {offsets = [7, 0], sizes = [1, 4], strides = [1, 1]} : vector<16x4xf32> to vector<1x4xf32>
    %29 = arith.maximumf %27, %28 : vector<1x4xf32>
    %30 = vector.extract_strided_slice %10 {offsets = [8, 0], sizes = [1, 4], strides = [1, 1]} : vector<16x4xf32> to vector<1x4xf32>
    %31 = arith.maximumf %29, %30 : vector<1x4xf32>
    %32 = vector.extract_strided_slice %10 {offsets = [9, 0], sizes = [1, 4], strides = [1, 1]} : vector<16x4xf32> to vector<1x4xf32>
    %33 = arith.maximumf %31, %32 : vector<1x4xf32>
    %34 = vector.extract_strided_slice %10 {offsets = [10, 0], sizes = [1, 4], strides = [1, 1]} : vector<16x4xf32> to vector<1x4xf32>
    %35 = arith.maximumf %33, %34 : vector<1x4xf32>
    %c0_16 = arith.constant 0 : index
    %c0_17 = arith.constant 0 : index
    %c1_18 = arith.constant 1 : index
    %c0_19 = arith.constant 0 : index
    %36 = vector.load %arg3[%c0_16, %c0_17, %c1_18, %c0_19] : memref<1x5x3x4xf32, #tpu.memory_space<vmem>>, vector<1x1x1x4xf32>
    %37 = vector.shape_cast %36 : vector<1x1x1x4xf32> to vector<1x4xf32>
    %38 = vector.shape_cast %35 : vector<1x4xf32> to vector<1x1x1x4xf32>
    tpu.vector_store %arg3[%c0_16, %c0_17, %c1_18, %c0_19], %38 {strides = array<i32>} : memref<1x5x3x4xf32, #tpu.memory_space<vmem>>, vector<1x1x1x4xf32>,
    %39 = vector.extract_strided_slice %10 {offsets = [10, 0], sizes = [1, 4], strides = [1, 1]} : vector<16x4xf32> to vector<1x4xf32>
    %40 = vector.extract_strided_slice %10 {offsets = [11, 0], sizes = [1, 4], strides = [1, 1]} : vector<16x4xf32> to vector<1x4xf32>
    %41 = arith.maximumf %39, %40 : vector<1x4xf32>
    %42 = vector.extract_strided_slice %10 {offsets = [12, 0], sizes = [1, 4], strides = [1, 1]} : vector<16x4xf32> to vector<1x4xf32>
    %43 = arith.maximumf %41, %42 : vector<1x4xf32>
    %44 = vector.extract_strided_slice %10 {offsets = [13, 0], sizes = [1, 4], strides = [1, 1]} : vector<16x4xf32> to vector<1x4xf32>
    %45 = arith.maximumf %43, %44 : vector<1x4xf32>
    %46 = vector.extract_strided_slice %10 {offsets = [14, 0], sizes = [1, 4], strides = [1, 1]} : vector<16x4xf32> to vector<1x4xf32>
    %47 = arith.maximumf %45, %46 : vector<1x4xf32>
    %48 = vector.extract_strided_slice %10 {offsets = [15, 0], sizes = [1, 4], strides = [1, 1]} : vector<16x4xf32> to vector<1x4xf32>
    %49 = arith.maximumf %47, %48 : vector<1x4xf32>
    %c0_20 = arith.constant 0 : index
    %c0_21 = arith.constant 0 : index
    %c2_22 = arith.constant 2 : index
    %c0_23 = arith.constant 0 : index
    %50 = vector.load %arg3[%c0_20, %c0_21, %c2_22, %c0_23] : memref<1x5x3x4xf32, #tpu.memory_space<vmem>>, vector<1x1x1x4xf32>
    %51 = vector.shape_cast %50 : vector<1x1x1x4xf32> to vector<1x4xf32>
    %52 = vector.shape_cast %49 : vector<1x4xf32> to vector<1x1x1x4xf32>
    tpu.vector_store %arg3[%c0_20, %c0_21, %c2_22, %c0_23], %52 {strides = array<i32>} : memref<1x5x3x4xf32, #tpu.memory_space<vmem>>, vector<1x1x1x4xf32>,
    %c0_24 = arith.constant 0 : index
    %c3_25 = arith.constant 3 : index
    %c0_26 = arith.constant 0 : index
    %c0_27 = arith.constant 0 : index
    %53 = vector.load %arg2[%c0_24, %c3_25, %c0_26, %c0_27] : memref<1x16x16x4xf32, #tpu.memory_space<vmem>>, vector<1x1x16x4xf32>
    %54 = vector.shape_cast %53 : vector<1x1x16x4xf32> to vector<16x4xf32>
    %c0_28 = arith.constant 0 : index
    %c4 = arith.constant 4 : index
    %c0_29 = arith.constant 0 : index
    %c0_30 = arith.constant 0 : index
    %55 = vector.load %arg2[%c0_28, %c4, %c0_29, %c0_30] : memref<1x16x16x4xf32, #tpu.memory_space<vmem>>, vector<1x1x16x4xf32>
    %56 = vector.shape_cast %55 : vector<1x1x16x4xf32> to vector<16x4xf32>
    %57 = arith.maximumf %54, %56 : vector<16x4xf32>
    %c0_31 = arith.constant 0 : index
    %c5 = arith.constant 5 : index
    %c0_32 = arith.constant 0 : index
    %c0_33 = arith.constant 0 : index
    %58 = vector.load %arg2[%c0_31, %c5, %c0_32, %c0_33] : memref<1x16x16x4xf32, #tpu.memory_space<vmem>>, vector<1x1x16x4xf32>
    %59 = vector.shape_cast %58 : vector<1x1x16x4xf32> to vector<16x4xf32>
    %60 = arith.maximumf %57, %59 : vector<16x4xf32>
    %c0_34 = arith.constant 0 : index
    %c6 = arith.constant 6 : index
    %c0_35 = arith.constant 0 : index
    %c0_36 = arith.constant 0 : index
    %61 = vector.load %arg2[%c0_34, %c6, %c0_35, %c0_36] : memref<1x16x16x4xf32, #tpu.memory_space<vmem>>, vector<1x1x16x4xf32>
    %62 = vector.shape_cast %61 : vector<1x1x16x4xf32> to vector<16x4xf32>
    %63 = arith.maximumf %60, %62 : vector<16x4xf32>
    %64 = vector.extract_strided_slice %63 {offsets = [0, 0], sizes = [1, 4], strides = [1, 1]} : vector<16x4xf32> to vector<1x4xf32>
    %65 = vector.extract_strided_slice %63 {offsets = [1, 0], sizes = [1, 4], strides = [1, 1]} : vector<16x4xf32> to vector<1x4xf32>
    %66 = arith.maximumf %64, %65 : vector<1x4xf32>
    %67 = vector.extract_strided_slice %63 {offsets = [2, 0], sizes = [1, 4], strides = [1, 1]} : vector<16x4xf32> to vector<1x4xf32>
    %68 = arith.maximumf %66, %67 : vector<1x4xf32>
    %69 = vector.extract_strided_slice %63 {offsets = [3, 0], sizes = [1, 4], strides = [1, 1]} : vector<16x4xf32> to vector<1x4xf32>
    %70 = arith.maximumf %68, %69 : vector<1x4xf32>
    %71 = vector.extract_strided_slice %63 {offsets = [4, 0], sizes = [1, 4], strides = [1, 1]} : vector<16x4xf32> to vector<1x4xf32>
    %72 = arith.maximumf %70, %71 : vector<1x4xf32>
    %73 = vector.extract_strided_slice %63 {offsets = [5, 0], sizes = [1, 4], strides = [1, 1]} : vector<16x4xf32> to vector<1x4xf32>
    %74 = arith.maximumf %72, %73 : vector<1x4xf32>
    %c0_37 = arith.constant 0 : index
    %c1_38 = arith.constant 1 : index
    %c0_39 = arith.constant 0 : index
    %c0_40 = arith.constant 0 : index
    %75 = vector.load %arg3[%c0_37, %c1_38, %c0_39, %c0_40] : memref<1x5x3x4xf32, #tpu.memory_space<vmem>>, vector<1x1x1x4xf32>
    %76 = vector.shape_cast %75 : vector<1x1x1x4xf32> to vector<1x4xf32>
    %77 = vector.shape_cast %74 : vector<1x4xf32> to vector<1x1x1x4xf32>
    tpu.vector_store %arg3[%c0_37, %c1_38, %c0_39, %c0_40], %77 {strides = array<i32>} : memref<1x5x3x4xf32, #tpu.memory_space<vmem>>, vector<1x1x1x4xf32>,
    %78 = vector.extract_strided_slice %63 {offsets = [5, 0], sizes = [1, 4], strides = [1, 1]} : vector<16x4xf32> to vector<1x4xf32>
    %79 = vector.extract_strided_slice %63 {offsets = [6, 0], sizes = [1, 4], strides = [1, 1]} : vector<16x4xf32> to vector<1x4xf32>
    %80 = arith.maximumf %78, %79 : vector<1x4xf32>
    %81 = vector.extract_strided_slice %63 {offsets = [7, 0], sizes = [1, 4], strides = [1, 1]} : vector<16x4xf32> to vector<1x4xf32>
    %82 = arith.maximumf %80, %81 : vector<1x4xf32>
    %83 = vector.extract_strided_slice %63 {offsets = [8, 0], sizes = [1, 4], strides = [1, 1]} : vector<16x4xf32> to vector<1x4xf32>
    %84 = arith.maximumf %82, %83 : vector<1x4xf32>
    %85 = vector.extract_strided_slice %63 {offsets = [9, 0], sizes = [1, 4], strides = [1, 1]} : vector<16x4xf32> to vector<1x4xf32>
    %86 = arith.maximumf %84, %85 : vector<1x4xf32>
    %87 = vector.extract_strided_slice %63 {offsets = [10, 0], sizes = [1, 4], strides = [1, 1]} : vector<16x4xf32> to vector<1x4xf32>
    %88 = arith.maximumf %86, %87 : vector<1x4xf32>
    %c0_41 = arith.constant 0 : index
    %c1_42 = arith.constant 1 : index
    %c1_43 = arith.constant 1 : index
    %c0_44 = arith.constant 0 : index
    %89 = vector.load %arg3[%c0_41, %c1_42, %c1_43, %c0_44] : memref<1x5x3x4xf32, #tpu.memory_space<vmem>>, vector<1x1x1x4xf32>
    %90 = vector.shape_cast %89 : vector<1x1x1x4xf32> to vector<1x4xf32>
    %91 = vector.shape_cast %88 : vector<1x4xf32> to vector<1x1x1x4xf32>
    tpu.vector_store %arg3[%c0_41, %c1_42, %c1_43, %c0_44], %91 {strides = array<i32>} : memref<1x5x3x4xf32, #tpu.memory_space<vmem>>, vector<1x1x1x4xf32>,
    %92 = vector.extract_strided_slice %63 {offsets = [10, 0], sizes = [1, 4], strides = [1, 1]} : vector<16x4xf32> to vector<1x4xf32>
    %93 = vector.extract_strided_slice %63 {offsets = [11, 0], sizes = [1, 4], strides = [1, 1]} : vector<16x4xf32> to vector<1x4xf32>
    %94 = arith.maximumf %92, %93 : vector<1x4xf32>
    %95 = vector.extract_strided_slice %63 {offsets = [12, 0], sizes = [1, 4], strides = [1, 1]} : vector<16x4xf32> to vector<1x4xf32>
    %96 = arith.maximumf %94, %95 : vector<1x4xf32>
    %97 = vector.extract_strided_slice %63 {offsets = [13, 0], sizes = [1, 4], strides = [1, 1]} : vector<16x4xf32> to vector<1x4xf32>
    %98 = arith.maximumf %96, %97 : vector<1x4xf32>
    %99 = vector.extract_strided_slice %63 {offsets = [14, 0], sizes = [1, 4], strides = [1, 1]} : vector<16x4xf32> to vector<1x4xf32>
    %100 = arith.maximumf %98, %99 : vector<1x4xf32>
    %101 = vector.extract_strided_slice %63 {offsets = [15, 0], sizes = [1, 4], strides = [1, 1]} : vector<16x4xf32> to vector<1x4xf32>
    %102 = arith.maximumf %100, %101 : vector<1x4xf32>
    %c0_45 = arith.constant 0 : index
    %c1_46 = arith.constant 1 : index
    %c2_47 = arith.constant 2 : index
    %c0_48 = arith.constant 0 : index
    %103 = vector.load %arg3[%c0_45, %c1_46, %c2_47, %c0_48] : memref<1x5x3x4xf32, #tpu.memory_space<vmem>>, vector<1x1x1x4xf32>
    %104 = vector.shape_cast %103 : vector<1x1x1x4xf32> to vector<1x4xf32>
    %105 = vector.shape_cast %102 : vector<1x4xf32> to vector<1x1x1x4xf32>
    tpu.vector_store %arg3[%c0_45, %c1_46, %c2_47, %c0_48], %105 {strides = array<i32>} : memref<1x5x3x4xf32, #tpu.memory_space<vmem>>, vector<1x1x1x4xf32>,
    %c0_49 = arith.constant 0 : index
    %c6_50 = arith.constant 6 : index
    %c0_51 = arith.constant 0 : index
    %c0_52 = arith.constant 0 : index
    %106 = vector.load %arg2[%c0_49, %c6_50, %c0_51, %c0_52] : memref<1x16x16x4xf32, #tpu.memory_space<vmem>>, vector<1x1x16x4xf32>
    %107 = vector.shape_cast %106 : vector<1x1x16x4xf32> to vector<16x4xf32>
    %c0_53 = arith.constant 0 : index
    %c7 = arith.constant 7 : index
    %c0_54 = arith.constant 0 : index
    %c0_55 = arith.constant 0 : index
    %108 = vector.load %arg2[%c0_53, %c7, %c0_54, %c0_55] : memref<1x16x16x4xf32, #tpu.memory_space<vmem>>, vector<1x1x16x4xf32>
    %109 = vector.shape_cast %108 : vector<1x1x16x4xf32> to vector<16x4xf32>
    %110 = arith.maximumf %107, %109 : vector<16x4xf32>
    %c0_56 = arith.constant 0 : index
    %c8 = arith.constant 8 : index
    %c0_57 = arith.constant 0 : index
    %c0_58 = arith.constant 0 : index
    %111 = vector.load %arg2[%c0_56, %c8, %c0_57, %c0_58] : memref<1x16x16x4xf32, #tpu.memory_space<vmem>>, vector<1x1x16x4xf32>
    %112 = vector.shape_cast %111 : vector<1x1x16x4xf32> to vector<16x4xf32>
    %113 = arith.maximumf %110, %112 : vector<16x4xf32>
    %c0_59 = arith.constant 0 : index
    %c9 = arith.constant 9 : index
    %c0_60 = arith.constant 0 : index
    %c0_61 = arith.constant 0 : index
    %114 = vector.load %arg2[%c0_59, %c9, %c0_60, %c0_61] : memref<1x16x16x4xf32, #tpu.memory_space<vmem>>, vector<1x1x16x4xf32>
    %115 = vector.shape_cast %114 : vector<1x1x16x4xf32> to vector<16x4xf32>
    %116 = arith.maximumf %113, %115 : vector<16x4xf32>
    %117 = vector.extract_strided_slice %116 {offsets = [0, 0], sizes = [1, 4], strides = [1, 1]} : vector<16x4xf32> to vector<1x4xf32>
    %118 = vector.extract_strided_slice %116 {offsets = [1, 0], sizes = [1, 4], strides = [1, 1]} : vector<16x4xf32> to vector<1x4xf32>
    %119 = arith.maximumf %117, %118 : vector<1x4xf32>
    %120 = vector.extract_strided_slice %116 {offsets = [2, 0], sizes = [1, 4], strides = [1, 1]} : vector<16x4xf32> to vector<1x4xf32>
    %121 = arith.maximumf %119, %120 : vector<1x4xf32>
    %122 = vector.extract_strided_slice %116 {offsets = [3, 0], sizes = [1, 4], strides = [1, 1]} : vector<16x4xf32> to vector<1x4xf32>
    %123 = arith.maximumf %121, %122 : vector<1x4xf32>
    %124 = vector.extract_strided_slice %116 {offsets = [4, 0], sizes = [1, 4], strides = [1, 1]} : vector<16x4xf32> to vector<1x4xf32>
    %125 = arith.maximumf %123, %124 : vector<1x4xf32>
    %126 = vector.extract_strided_slice %116 {offsets = [5, 0], sizes = [1, 4], strides = [1, 1]} : vector<16x4xf32> to vector<1x4xf32>
    %127 = arith.maximumf %125, %126 : vector<1x4xf32>
    %c0_62 = arith.constant 0 : index
    %c2_63 = arith.constant 2 : index
    %c0_64 = arith.constant 0 : index
    %c0_65 = arith.constant 0 : index
    %128 = vector.load %arg3[%c0_62, %c2_63, %c0_64, %c0_65] : memref<1x5x3x4xf32, #tpu.memory_space<vmem>>, vector<1x1x1x4xf32>
    %129 = vector.shape_cast %128 : vector<1x1x1x4xf32> to vector<1x4xf32>
    %130 = vector.shape_cast %127 : vector<1x4xf32> to vector<1x1x1x4xf32>
    tpu.vector_store %arg3[%c0_62, %c2_63, %c0_64, %c0_65], %130 {strides = array<i32>} : memref<1x5x3x4xf32, #tpu.memory_space<vmem>>, vector<1x1x1x4xf32>,
    %131 = vector.extract_strided_slice %116 {offsets = [5, 0], sizes = [1, 4], strides = [1, 1]} : vector<16x4xf32> to vector<1x4xf32>
    %132 = vector.extract_strided_slice %116 {offsets = [6, 0], sizes = [1, 4], strides = [1, 1]} : vector<16x4xf32> to vector<1x4xf32>
    %133 = arith.maximumf %131, %132 : vector<1x4xf32>
    %134 = vector.extract_strided_slice %116 {offsets = [7, 0], sizes = [1, 4], strides = [1, 1]} : vector<16x4xf32> to vector<1x4xf32>
    %135 = arith.maximumf %133, %134 : vector<1x4xf32>
    %136 = vector.extract_strided_slice %116 {offsets = [8, 0], sizes = [1, 4], strides = [1, 1]} : vector<16x4xf32> to vector<1x4xf32>
    %137 = arith.maximumf %135, %136 : vector<1x4xf32>
    %138 = vector.extract_strided_slice %116 {offsets = [9, 0], sizes = [1, 4], strides = [1, 1]} : vector<16x4xf32> to vector<1x4xf32>
    %139 = arith.maximumf %137, %138 : vector<1x4xf32>
    %140 = vector.extract_strided_slice %116 {offsets = [10, 0], sizes = [1, 4], strides = [1, 1]} : vector<16x4xf32> to vector<1x4xf32>
    %141 = arith.maximumf %139, %140 : vector<1x4xf32>
    %c0_66 = arith.constant 0 : index
    %c2_67 = arith.constant 2 : index
    %c1_68 = arith.constant 1 : index
    %c0_69 = arith.constant 0 : index
    %142 = vector.load %arg3[%c0_66, %c2_67, %c1_68, %c0_69] : memref<1x5x3x4xf32, #tpu.memory_space<vmem>>, vector<1x1x1x4xf32>
    %143 = vector.shape_cast %142 : vector<1x1x1x4xf32> to vector<1x4xf32>
    %144 = vector.shape_cast %141 : vector<1x4xf32> to vector<1x1x1x4xf32>
    tpu.vector_store %arg3[%c0_66, %c2_67, %c1_68, %c0_69], %144 {strides = array<i32>} : memref<1x5x3x4xf32, #tpu.memory_space<vmem>>, vector<1x1x1x4xf32>,
    %145 = vector.extract_strided_slice %116 {offsets = [10, 0], sizes = [1, 4], strides = [1, 1]} : vector<16x4xf32> to vector<1x4xf32>
    %146 = vector.extract_strided_slice %116 {offsets = [11, 0], sizes = [1, 4], strides = [1, 1]} : vector<16x4xf32> to vector<1x4xf32>
    %147 = arith.maximumf %145, %146 : vector<1x4xf32>
    %148 = vector.extract_strided_slice %116 {offsets = [12, 0], sizes = [1, 4], strides = [1, 1]} : vector<16x4xf32> to vector<1x4xf32>
    %149 = arith.maximumf %147, %148 : vector<1x4xf32>
    %150 = vector.extract_strided_slice %116 {offsets = [13, 0], sizes = [1, 4], strides = [1, 1]} : vector<16x4xf32> to vector<1x4xf32>
    %151 = arith.maximumf %149, %150 : vector<1x4xf32>
    %152 = vector.extract_strided_slice %116 {offsets = [14, 0], sizes = [1, 4], strides = [1, 1]} : vector<16x4xf32> to vector<1x4xf32>
    %153 = arith.maximumf %151, %152 : vector<1x4xf32>
    %154 = vector.extract_strided_slice %116 {offsets = [15, 0], sizes = [1, 4], strides = [1, 1]} : vector<16x4xf32> to vector<1x4xf32>
    %155 = arith.maximumf %153, %154 : vector<1x4xf32>
    %c0_70 = arith.constant 0 : index
    %c2_71 = arith.constant 2 : index
    %c2_72 = arith.constant 2 : index
    %c0_73 = arith.constant 0 : index
    %156 = vector.load %arg3[%c0_70, %c2_71, %c2_72, %c0_73] : memref<1x5x3x4xf32, #tpu.memory_space<vmem>>, vector<1x1x1x4xf32>
    %157 = vector.shape_cast %156 : vector<1x1x1x4xf32> to vector<1x4xf32>
    %158 = vector.shape_cast %155 : vector<1x4xf32> to vector<1x1x1x4xf32>
    tpu.vector_store %arg3[%c0_70, %c2_71, %c2_72, %c0_73], %158 {strides = array<i32>} : memref<1x5x3x4xf32, #tpu.memory_space<vmem>>, vector<1x1x1x4xf32>,
    %c0_74 = arith.constant 0 : index
    %c9_75 = arith.constant 9 : index
    %c0_76 = arith.constant 0 : index
    %c0_77 = arith.constant 0 : index
    %159 = vector.load %arg2[%c0_74, %c9_75, %c0_76, %c0_77] : memref<1x16x16x4xf32, #tpu.memory_space<vmem>>, vector<1x1x16x4xf32>
    %160 = vector.shape_cast %159 : vector<1x1x16x4xf32> to vector<16x4xf32>
    %c0_78 = arith.constant 0 : index
    %c10 = arith.constant 10 : index
    %c0_79 = arith.constant 0 : index
    %c0_80 = arith.constant 0 : index
    %161 = vector.load %arg2[%c0_78, %c10, %c0_79, %c0_80] : memref<1x16x16x4xf32, #tpu.memory_space<vmem>>, vector<1x1x16x4xf32>
    %162 = vector.shape_cast %161 : vector<1x1x16x4xf32> to vector<16x4xf32>
    %163 = arith.maximumf %160, %162 : vector<16x4xf32>
    %c0_81 = arith.constant 0 : index
    %c11 = arith.constant 11 : index
    %c0_82 = arith.constant 0 : index
    %c0_83 = arith.constant 0 : index
    %164 = vector.load %arg2[%c0_81, %c11, %c0_82, %c0_83] : memref<1x16x16x4xf32, #tpu.memory_space<vmem>>, vector<1x1x16x4xf32>
    %165 = vector.shape_cast %164 : vector<1x1x16x4xf32> to vector<16x4xf32>
    %166 = arith.maximumf %163, %165 : vector<16x4xf32>
    %c0_84 = arith.constant 0 : index
    %c12 = arith.constant 12 : index
    %c0_85 = arith.constant 0 : index
    %c0_86 = arith.constant 0 : index
    %167 = vector.load %arg2[%c0_84, %c12, %c0_85, %c0_86] : memref<1x16x16x4xf32, #tpu.memory_space<vmem>>, vector<1x1x16x4xf32>
    %168 = vector.shape_cast %167 : vector<1x1x16x4xf32> to vector<16x4xf32>
    %169 = arith.maximumf %166, %168 : vector<16x4xf32>
    %170 = vector.extract_strided_slice %169 {offsets = [0, 0], sizes = [1, 4], strides = [1, 1]} : vector<16x4xf32> to vector<1x4xf32>
    %171 = vector.extract_strided_slice %169 {offsets = [1, 0], sizes = [1, 4], strides = [1, 1]} : vector<16x4xf32> to vector<1x4xf32>
    %172 = arith.maximumf %170, %171 : vector<1x4xf32>
    %173 = vector.extract_strided_slice %169 {offsets = [2, 0], sizes = [1, 4], strides = [1, 1]} : vector<16x4xf32> to vector<1x4xf32>
    %174 = arith.maximumf %172, %173 : vector<1x4xf32>
    %175 = vector.extract_strided_slice %169 {offsets = [3, 0], sizes = [1, 4], strides = [1, 1]} : vector<16x4xf32> to vector<1x4xf32>
    %176 = arith.maximumf %174, %175 : vector<1x4xf32>
    %177 = vector.extract_strided_slice %169 {offsets = [4, 0], sizes = [1, 4], strides = [1, 1]} : vector<16x4xf32> to vector<1x4xf32>
    %178 = arith.maximumf %176, %177 : vector<1x4xf32>
    %179 = vector.extract_strided_slice %169 {offsets = [5, 0], sizes = [1, 4], strides = [1, 1]} : vector<16x4xf32> to vector<1x4xf32>
    %180 = arith.maximumf %178, %179 : vector<1x4xf32>
    %c0_87 = arith.constant 0 : index
    %c3_88 = arith.constant 3 : index
    %c0_89 = arith.constant 0 : index
    %c0_90 = arith.constant 0 : index
    %181 = vector.load %arg3[%c0_87, %c3_88, %c0_89, %c0_90] : memref<1x5x3x4xf32, #tpu.memory_space<vmem>>, vector<1x1x1x4xf32>
    %182 = vector.shape_cast %181 : vector<1x1x1x4xf32> to vector<1x4xf32>
    %183 = vector.shape_cast %180 : vector<1x4xf32> to vector<1x1x1x4xf32>
    tpu.vector_store %arg3[%c0_87, %c3_88, %c0_89, %c0_90], %183 {strides = array<i32>} : memref<1x5x3x4xf32, #tpu.memory_space<vmem>>, vector<1x1x1x4xf32>,
    %184 = vector.extract_strided_slice %169 {offsets = [5, 0], sizes = [1, 4], strides = [1, 1]} : vector<16x4xf32> to vector<1x4xf32>
    %185 = vector.extract_strided_slice %169 {offsets = [6, 0], sizes = [1, 4], strides = [1, 1]} : vector<16x4xf32> to vector<1x4xf32>
    %186 = arith.maximumf %184, %185 : vector<1x4xf32>
    %187 = vector.extract_strided_slice %169 {offsets = [7, 0], sizes = [1, 4], strides = [1, 1]} : vector<16x4xf32> to vector<1x4xf32>
    %188 = arith.maximumf %186, %187 : vector<1x4xf32>
    %189 = vector.extract_strided_slice %169 {offsets = [8, 0], sizes = [1, 4], strides = [1, 1]} : vector<16x4xf32> to vector<1x4xf32>
    %190 = arith.maximumf %188, %189 : vector<1x4xf32>
    %191 = vector.extract_strided_slice %169 {offsets = [9, 0], sizes = [1, 4], strides = [1, 1]} : vector<16x4xf32> to vector<1x4xf32>
    %192 = arith.maximumf %190, %191 : vector<1x4xf32>
    %193 = vector.extract_strided_slice %169 {offsets = [10, 0], sizes = [1, 4], strides = [1, 1]} : vector<16x4xf32> to vector<1x4xf32>
    %194 = arith.maximumf %192, %193 : vector<1x4xf32>
    %c0_91 = arith.constant 0 : index
    %c3_92 = arith.constant 3 : index
    %c1_93 = arith.constant 1 : index
    %c0_94 = arith.constant 0 : index
    %195 = vector.load %arg3[%c0_91, %c3_92, %c1_93, %c0_94] : memref<1x5x3x4xf32, #tpu.memory_space<vmem>>, vector<1x1x1x4xf32>
    %196 = vector.shape_cast %195 : vector<1x1x1x4xf32> to vector<1x4xf32>
    %197 = vector.shape_cast %194 : vector<1x4xf32> to vector<1x1x1x4xf32>
    tpu.vector_store %arg3[%c0_91, %c3_92, %c1_93, %c0_94], %197 {strides = array<i32>} : memref<1x5x3x4xf32, #tpu.memory_space<vmem>>, vector<1x1x1x4xf32>,
    %198 = vector.extract_strided_slice %169 {offsets = [10, 0], sizes = [1, 4], strides = [1, 1]} : vector<16x4xf32> to vector<1x4xf32>
    %199 = vector.extract_strided_slice %169 {offsets = [11, 0], sizes = [1, 4], strides = [1, 1]} : vector<16x4xf32> to vector<1x4xf32>
    %200 = arith.maximumf %198, %199 : vector<1x4xf32>
    %201 = vector.extract_strided_slice %169 {offsets = [12, 0], sizes = [1, 4], strides = [1, 1]} : vector<16x4xf32> to vector<1x4xf32>
    %202 = arith.maximumf %200, %201 : vector<1x4xf32>
    %203 = vector.extract_strided_slice %169 {offsets = [13, 0], sizes = [1, 4], strides = [1, 1]} : vector<16x4xf32> to vector<1x4xf32>
    %204 = arith.maximumf %202, %203 : vector<1x4xf32>
    %205 = vector.extract_strided_slice %169 {offsets = [14, 0], sizes = [1, 4], strides = [1, 1]} : vector<16x4xf32> to vector<1x4xf32>
    %206 = arith.maximumf %204, %205 : vector<1x4xf32>
    %207 = vector.extract_strided_slice %169 {offsets = [15, 0], sizes = [1, 4], strides = [1, 1]} : vector<16x4xf32> to vector<1x4xf32>
    %208 = arith.maximumf %206, %207 : vector<1x4xf32>
    %c0_95 = arith.constant 0 : index
    %c3_96 = arith.constant 3 : index
    %c2_97 = arith.constant 2 : index
    %c0_98 = arith.constant 0 : index
    %209 = vector.load %arg3[%c0_95, %c3_96, %c2_97, %c0_98] : memref<1x5x3x4xf32, #tpu.memory_space<vmem>>, vector<1x1x1x4xf32>
    %210 = vector.shape_cast %209 : vector<1x1x1x4xf32> to vector<1x4xf32>
    %211 = vector.shape_cast %208 : vector<1x4xf32> to vector<1x1x1x4xf32>
    tpu.vector_store %arg3[%c0_95, %c3_96, %c2_97, %c0_98], %211 {strides = array<i32>} : memref<1x5x3x4xf32, #tpu.memory_space<vmem>>, vector<1x1x1x4xf32>,
    %c0_99 = arith.constant 0 : index
    %c12_100 = arith.constant 12 : index
    %c0_101 = arith.constant 0 : index
    %c0_102 = arith.constant 0 : index
    %212 = vector.load %arg2[%c0_99, %c12_100, %c0_101, %c0_102] : memref<1x16x16x4xf32, #tpu.memory_space<vmem>>, vector<1x1x16x4xf32>
    %213 = vector.shape_cast %212 : vector<1x1x16x4xf32> to vector<16x4xf32>
    %c0_103 = arith.constant 0 : index
    %c13 = arith.constant 13 : index
    %c0_104 = arith.constant 0 : index
    %c0_105 = arith.constant 0 : index
    %214 = vector.load %arg2[%c0_103, %c13, %c0_104, %c0_105] : memref<1x16x16x4xf32, #tpu.memory_space<vmem>>, vector<1x1x16x4xf32>
    %215 = vector.shape_cast %214 : vector<1x1x16x4xf32> to vector<16x4xf32>
    %216 = arith.maximumf %213, %215 : vector<16x4xf32>
    %c0_106 = arith.constant 0 : index
    %c14 = arith.constant 14 : index
    %c0_107 = arith.constant 0 : index
    %c0_108 = arith.constant 0 : index
    %217 = vector.load %arg2[%c0_106, %c14, %c0_107, %c0_108] : memref<1x16x16x4xf32, #tpu.memory_space<vmem>>, vector<1x1x16x4xf32>
    %218 = vector.shape_cast %217 : vector<1x1x16x4xf32> to vector<16x4xf32>
    %219 = arith.maximumf %216, %218 : vector<16x4xf32>
    %c0_109 = arith.constant 0 : index
    %c15 = arith.constant 15 : index
    %c0_110 = arith.constant 0 : index
    %c0_111 = arith.constant 0 : index
    %220 = vector.load %arg2[%c0_109, %c15, %c0_110, %c0_111] : memref<1x16x16x4xf32, #tpu.memory_space<vmem>>, vector<1x1x16x4xf32>
    %221 = vector.shape_cast %220 : vector<1x1x16x4xf32> to vector<16x4xf32>
    %222 = arith.maximumf %219, %221 : vector<16x4xf32>
    %223 = vector.extract_strided_slice %222 {offsets = [0, 0], sizes = [1, 4], strides = [1, 1]} : vector<16x4xf32> to vector<1x4xf32>
    %224 = vector.extract_strided_slice %222 {offsets = [1, 0], sizes = [1, 4], strides = [1, 1]} : vector<16x4xf32> to vector<1x4xf32>
    %225 = arith.maximumf %223, %224 : vector<1x4xf32>
    %226 = vector.extract_strided_slice %222 {offsets = [2, 0], sizes = [1, 4], strides = [1, 1]} : vector<16x4xf32> to vector<1x4xf32>
    %227 = arith.maximumf %225, %226 : vector<1x4xf32>
    %228 = vector.extract_strided_slice %222 {offsets = [3, 0], sizes = [1, 4], strides = [1, 1]} : vector<16x4xf32> to vector<1x4xf32>
    %229 = arith.maximumf %227, %228 : vector<1x4xf32>
    %230 = vector.extract_strided_slice %222 {offsets = [4, 0], sizes = [1, 4], strides = [1, 1]} : vector<16x4xf32> to vector<1x4xf32>
    %231 = arith.maximumf %229, %230 : vector<1x4xf32>
    %232 = vector.extract_strided_slice %222 {offsets = [5, 0], sizes = [1, 4], strides = [1, 1]} : vector<16x4xf32> to vector<1x4xf32>
    %233 = arith.maximumf %231, %232 : vector<1x4xf32>
    %c0_112 = arith.constant 0 : index
    %c4_113 = arith.constant 4 : index
    %c0_114 = arith.constant 0 : index
    %c0_115 = arith.constant 0 : index
    %234 = vector.load %arg3[%c0_112, %c4_113, %c0_114, %c0_115] : memref<1x5x3x4xf32, #tpu.memory_space<vmem>>, vector<1x1x1x4xf32>
    %235 = vector.shape_cast %234 : vector<1x1x1x4xf32> to vector<1x4xf32>
    %236 = vector.shape_cast %233 : vector<1x4xf32> to vector<1x1x1x4xf32>
    tpu.vector_store %arg3[%c0_112, %c4_113, %c0_114, %c0_115], %236 {strides = array<i32>} : memref<1x5x3x4xf32, #tpu.memory_space<vmem>>, vector<1x1x1x4xf32>,
    %237 = vector.extract_strided_slice %222 {offsets = [5, 0], sizes = [1, 4], strides = [1, 1]} : vector<16x4xf32> to vector<1x4xf32>
    %238 = vector.extract_strided_slice %222 {offsets = [6, 0], sizes = [1, 4], strides = [1, 1]} : vector<16x4xf32> to vector<1x4xf32>
    %239 = arith.maximumf %237, %238 : vector<1x4xf32>
    %240 = vector.extract_strided_slice %222 {offsets = [7, 0], sizes = [1, 4], strides = [1, 1]} : vector<16x4xf32> to vector<1x4xf32>
    %241 = arith.maximumf %239, %240 : vector<1x4xf32>
    %242 = vector.extract_strided_slice %222 {offsets = [8, 0], sizes = [1, 4], strides = [1, 1]} : vector<16x4xf32> to vector<1x4xf32>
    %243 = arith.maximumf %241, %242 : vector<1x4xf32>
    %244 = vector.extract_strided_slice %222 {offsets = [9, 0], sizes = [1, 4], strides = [1, 1]} : vector<16x4xf32> to vector<1x4xf32>
    %245 = arith.maximumf %243, %244 : vector<1x4xf32>
    %246 = vector.extract_strided_slice %222 {offsets = [10, 0], sizes = [1, 4], strides = [1, 1]} : vector<16x4xf32> to vector<1x4xf32>
    %247 = arith.maximumf %245, %246 : vector<1x4xf32>
    %c0_116 = arith.constant 0 : index
    %c4_117 = arith.constant 4 : index
    %c1_118 = arith.constant 1 : index
    %c0_119 = arith.constant 0 : index
    %248 = vector.load %arg3[%c0_116, %c4_117, %c1_118, %c0_119] : memref<1x5x3x4xf32, #tpu.memory_space<vmem>>, vector<1x1x1x4xf32>
    %249 = vector.shape_cast %248 : vector<1x1x1x4xf32> to vector<1x4xf32>
    %250 = vector.shape_cast %247 : vector<1x4xf32> to vector<1x1x1x4xf32>
    tpu.vector_store %arg3[%c0_116, %c4_117, %c1_118, %c0_119], %250 {strides = array<i32>} : memref<1x5x3x4xf32, #tpu.memory_space<vmem>>, vector<1x1x1x4xf32>,
    %251 = vector.extract_strided_slice %222 {offsets = [10, 0], sizes = [1, 4], strides = [1, 1]} : vector<16x4xf32> to vector<1x4xf32>
    %252 = vector.extract_strided_slice %222 {offsets = [11, 0], sizes = [1, 4], strides = [1, 1]} : vector<16x4xf32> to vector<1x4xf32>
    %253 = arith.maximumf %251, %252 : vector<1x4xf32>
    %254 = vector.extract_strided_slice %222 {offsets = [12, 0], sizes = [1, 4], strides = [1, 1]} : vector<16x4xf32> to vector<1x4xf32>
    %255 = arith.maximumf %253, %254 : vector<1x4xf32>
    %256 = vector.extract_strided_slice %222 {offsets = [13, 0], sizes = [1, 4], strides = [1, 1]} : vector<16x4xf32> to vector<1x4xf32>
    %257 = arith.maximumf %255, %256 : vector<1x4xf32>
    %258 = vector.extract_strided_slice %222 {offsets = [14, 0], sizes = [1, 4], strides = [1, 1]} : vector<16x4xf32> to vector<1x4xf32>
    %259 = arith.maximumf %257, %258 : vector<1x4xf32>
    %260 = vector.extract_strided_slice %222 {offsets = [15, 0], sizes = [1, 4], strides = [1, 1]} : vector<16x4xf32> to vector<1x4xf32>
    %261 = arith.maximumf %259, %260 : vector<1x4xf32>
    %c0_120 = arith.constant 0 : index
    %c4_121 = arith.constant 4 : index
    %c2_122 = arith.constant 2 : index
    %c0_123 = arith.constant 0 : index
    %262 = vector.load %arg3[%c0_120, %c4_121, %c2_122, %c0_123] : memref<1x5x3x4xf32, #tpu.memory_space<vmem>>, vector<1x1x1x4xf32>
    %263 = vector.shape_cast %262 : vector<1x1x1x4xf32> to vector<1x4xf32>
    %264 = vector.shape_cast %261 : vector<1x4xf32> to vector<1x1x1x4xf32>
    tpu.vector_store %arg3[%c0_120, %c4_121, %c2_122, %c0_123], %264 {strides = array<i32>} : memref<1x5x3x4xf32, #tpu.memory_space<vmem>>, vector<1x1x1x4xf32>,
    return
  }
  func.func @transform_0(%arg0: i32, %arg1: i32) -> (i32, i32, i32, i32) {
    %c0_i32 = arith.constant 0 : i32
    %c0_i32_0 = arith.constant 0 : i32
    %c0_i32_1 = arith.constant 0 : i32
    return %arg0, %c0_i32, %c0_i32_0, %arg1 : i32, i32, i32, i32
  }
  func.func @transform_1(%arg0: i32, %arg1: i32) -> (i32, i32, i32, i32) {
    %c0_i32 = arith.constant 0 : i32
    %c0_i32_0 = arith.constant 0 : i32
    %c0_i32_1 = arith.constant 0 : i32
    return %arg0, %c0_i32, %c0_i32_0, %arg1 : i32, i32, i32, i32
  }
}

</mosaic_0001>

<bundles_post_ra>
// kernel: tpu_custom_call.1
= control target key start
LH: loop header
LB: loop body
LE: loop exit
PB: predicated region body
PF: predicated region fallthrough
CT: control target
= control target key end

     0   :  { %s633_s6 = smov 0   ;;  %s635_s7 = smov 0   ;;  %s760_s0 = inlined_call_operand.vmem [shape: f32[2,16,16,4], index: 0, kind: input, shape index: {}]   ;;  %s761_s1 = inlined_call_operand.vmem [shape: f32[2,5,3,4], index: 1, kind: output, shape index: {}]  }
   0x1   :  { %s637_s8 = smov 0  }
   0x2 LB: > { %s23_s9 = sadd.s32 1, %s617_s7  ;;  %p517_p0 = scmp.ge.s32.totalorder %s621_s8, 1  ;;  %s621_s8 = sphi %s637_s8, %s11_s8   ;;  %s617_s7 = sphi %s635_s7, %s763_s7   ;;  %s613_s6 = sphi %s633_s6, %s762_s6  }
   0x3   : > { %p25_p1 = scmp.ge.s32.totalorder %s23_s9, 2  ;;  %p106_p2 = scmp.lt.s32.totalorder %s621_s8, 3 }
   0x5   : > { %s765_s9 = smov (%p25_p1, %s23_s9), 0  ;;  %p107_p3 = pnand %p517_p0, %p106_p2 }
   0x6   : > { %p132_p4 = scmp.lt.s32.totalorder (!%p107_p3), %s613_s6, 1  ;;  %vm181_vm0 = vcmask (!%p107_p3), 24576   ;;  %vm193_vm1 = vcmask (!%p107_p3), 29701   ;;  %vm204_vm2 = vcmask (!%p107_p3), 26626  }
   0x7   : > { %110 = sbr.rel (%p107_p3) target bundleno = 66 (0x42), region = 24 }
   0xe   : > { %s767_s6 = smov (!%p132_p4, %s613_s6), 1 }
   0xf   : > { %s573_s10 = sshll.u32 %s767_s6, 8  ;;  %s574_s14 = smul.u32 20, %s767_s6 }
  0x10   : > { %s657_s13 = scalar_lea.vmem %s760_s0, %s573_s10 }
  0x11   : > { %v148_v0 = vld [vmem:[%s657_s13] sm:$0xff]  ;;  %v521_v1 = vld [vmem:[%s657_s13 + $0x10] sm:$0xff]  ;;  %v149_v5 = vld [vmem:[%s657_s13 + $0x8] sm:$0xff]  ;;  %s700_s17 = scalar_lea.vmem %s761_s1, %s574_s14 }
  0x12   : > { %v523_v2 = vld [vmem:[%s657_s13 + $0x20] sm:$0xff]  ;;  %v153_v3 = vmax.f32 %v148_v0, %v521_v1  ;;  %v525_v4 = vld [vmem:[%s657_s13 + $0x30] sm:$0xff]  ;;  %v522_v6 = vld [vmem:[%s657_s13 + $0x18] sm:$0xff] }
  0x13   : > { %v154_v7 = vmax.f32 %v149_v5, %v522_v6  ;;  %v524_v8 = vld [vmem:[%s657_s13 + $0x28] sm:$0xff]  ;;  %v526_v9 = vld [vmem:[%s657_s13 + $0x38] sm:$0xff]  ;;  %v529_v10 = vld [vmem:[%s657_s13 + $0x40] sm:$0xff] }
  0x14   : > { %v158_v11 = vmax.f32 %v153_v3, %v523_v2  ;;  %v211_v12 = vmax.f32 %v525_v4, %v529_v10  ;;  %v531_v13 = vld [vmem:[%s657_s13 + $0x50] sm:$0xff]  ;;  %v533_v14 = vld [vmem:[%s657_s13 + $0x60] sm:$0xff]  ;;  %v530_v15 = vld [vmem:[%s657_s13 + $0x48] sm:$0xff] }
  0x15   : > { %v159_v16 = vmax.f32 %v154_v7, %v524_v8  ;;  %v212_v17 = vmax.f32 %v526_v9, %v530_v15  ;;  %v532_v18 = vld [vmem:[%s657_s13 + $0x58] sm:$0xff]  ;;  %v534_v19 = vld [vmem:[%s657_s13 + $0x68] sm:$0xff]  ;;  %v540_v20 = vld [vmem:[%s657_s13 + $0x70] sm:$0xff] }
  0x16   : > { %v163_v21 = vmax.f32 %v158_v11, %v525_v4  ;;  %v216_v22 = vmax.f32 %v211_v12, %v531_v13  ;;  %v541_v23 = vld [vmem:[%s657_s13 + $0x78] sm:$0xff]  ;;  %v267_v26 = vmax.f32 %v533_v14, %v540_v20  ;;  %v542_v27 = vld [vmem:[%s657_s13 + $0x80] sm:$0xff]  ;;  %v544_v28 = vld [vmem:[%s657_s13 + $0x90] sm:$0xff] }
  0x17   : > { %v675_v24 = vmax.f32 %v159_v16, %v526_v9  ;;  %v217_v25 = vmax.f32 %v212_v17, %v532_v18  ;;  %v268_v29 = vmax.f32 %v534_v19, %v541_v23  ;;  %v543_v34 = vld [vmem:[%s657_s13 + $0x88] sm:$0xff]  ;;  %v551_v35 = vld [vmem:[%s657_s13 + $0xa0] sm:$0xff]  ;;  %v553_v60 = vld [vmem:[%s657_s13 + $0xb0] sm:$0xff] }
  0x18   : > { %v166_v30 = vrot.slane %v163_v21, 1  ;;  %v169_v31 = vrot.slane %v163_v21, 2  ;;  %v172_v32 = vrot.slane %v163_v21, 3  ;;  %v175_v33 = vrot.slane %v163_v21, 4  ;;  %v545_v5 = vld [vmem:[%s657_s13 + $0x98] sm:$0xff] }
  0x19   : > { %v178_v36 = vrot.slane %v163_v21, 5  ;;  %v184_v37 = vrot.slane %v675_v24, 3  ;;  %v187_v38 = vrot.slane %v675_v24, 4  ;;  %v190_v39 = vrot.slane %v675_v24, 5 }
  0x1a   : > { %v168_v40 = vmax.f32 %v163_v21, %v166_v30  ;;  %v195_v41 = vrot.slane %v675_v24, 1  ;;  %v198_v42 = vrot.slane %v675_v24, 2  ;;  %v221_v43 = vmax.f32 %v216_v22, %v533_v14 }
  0x1b   : > { %v686_v44 = vmax.f32 %v217_v25, %v534_v19  ;;  %v272_v45 = vmax.f32 %v267_v26, %v542_v27  ;;  %v273_v46 = vmax.f32 %v268_v29, %v543_v34  ;;  %v323_v47 = vmax.f32 %v544_v28, %v551_v35  ;;  %v555_v26 = vld [vmem:[%s657_s13 + $0xc0] sm:$0xff]  ;;  %v552_v27 = vld [vmem:[%s657_s13 + $0xa8] sm:$0xff] }
  0x1c   : > { %v171_v48 = vmax.f32 %v168_v40, %v169_v31  ;;  %v197_v49 = vmax.f32 %v675_v24, %v195_v41  ;;  %v224_v50 = vrot.slane %v221_v43, 1  ;;  %v227_v51 = vrot.slane %v221_v43, 2  ;;  %v554_v40 = vld [vmem:[%s657_s13 + $0xb8] sm:$0xff] }
  0x1d   : > { %v230_v52 = vrot.slane %v221_v43, 3  ;;  %v233_v53 = vrot.slane %v221_v43, 4  ;;  %v236_v54 = vrot.slane %v221_v43, 5  ;;  %v242_v55 = vrot.slane %v686_v44, 3 }
  0x1e   : > { %v174_v56 = vmax.f32 %v171_v48, %v172_v32  ;;  %v186_v57 = vmax.f32 %v171_v48, %v184_v37  ;;  %v200_v58 = vmax.f32 %v197_v49, %v198_v42  ;;  %v226_v59 = vmax.f32 %v221_v43, %v224_v50  ;;  %v563_v48 = vld [vmem:[%s657_s13 + $0xd8] sm:$0xff] }
  0x1f   : > { %v245_v61 = vrot.slane %v686_v44, 4  ;;  %v248_v62 = vrot.slane %v686_v44, 5  ;;  %v252_v63 = vrot.slane %v686_v44, 1  ;;  %v255_v0 = vrot.slane %v686_v44, 2 }
  0x20   : > { %v177_v1 = vmax.f32 %v174_v56, %v175_v33  ;;  %v189_v2 = vmax.f32 %v186_v57, %v187_v38  ;;  %v201_v3 = vmax.f32 %v200_v58, %v184_v37  ;;  %v229_v4 = vmax.f32 %v226_v59, %v227_v51 }
  0x21   : > { %v254_v6 = vmax.f32 %v686_v44, %v252_v63  ;;  %v277_v7 = vmax.f32 %v272_v45, %v544_v28  ;;  %v703_v8 = vmax.f32 %v273_v46, %v545_v5  ;;  %v328_v9 = vmax.f32 %v323_v47, %v553_v60  ;;  %v562_v28 = vld [vmem:[%s657_s13 + $0xd0] sm:$0xff]  ;;  %v556_v46 = vld [vmem:[%s657_s13 + $0xc8] sm:$0xff]  ;;  %v564_v47 = vld [vmem:[%s657_s13 + $0xe0] sm:$0xff] }
  0x22   : > { %v180_v10 = vmax.f32 %v177_v1, %v178_v36  ;;  %v192_v11 = vmax.f32 %v189_v2, %v190_v39  ;;  %v202_v12 = vmax.f32 %v201_v3, %v187_v38  ;;  %v232_v13 = vmax.f32 %v229_v4, %v230_v52  ;;  %v565_v63 = vld [vmem:[%s657_s13 + $0xe8] sm:$0xff] }
  0x23   : > { %v244_v14 = vmax.f32 %v229_v4, %v242_v55  ;;  %v257_v15 = vmax.f32 %v254_v6, %v255_v0  ;;  %v280_v16 = vrot.slane %v277_v7, 1  ;;  %v283_v17 = vrot.slane %v277_v7, 2 }
  0x24   : > { %182 = vst.msk [vmem:[%s700_s17] sm:$0x1] %vm181_vm0, %v180_v10  ;;  %v203_v18 = vmax.f32 %v202_v12, %v190_v39  ;;  %v235_v19 = vmax.f32 %v232_v13, %v233_v53  ;;  %v286_v20 = vrot.slane %v277_v7, 3  ;;  %v289_v21 = vrot.slane %v277_v7, 4 }
  0x25   : > { %194 = vst.msk [vmem:[%s700_s17 - $0x4] sm:$0x20] %vm193_vm1, %v192_v11  ;;  %v247_v22 = vmax.f32 %v244_v14, %v245_v61  ;;  %v258_v23 = vmax.f32 %v257_v15, %v242_v55  ;;  %v282_v24 = vmax.f32 %v277_v7, %v280_v16  ;;  %v292_v25 = vrot.slane %v277_v7, 5  ;;  %v566_v55 = vld [vmem:[%s657_s13 + $0xf0] sm:$0xff]  ;;  %v567_v14 = vld [vmem:[%s657_s13 + $0xf8] sm:$0xff] }
  0x26   : > { %205 = vst.msk [vmem:[%s700_s17] sm:$0x4] %vm204_vm2, %v203_v18  ;;  %v238_v29 = vmax.f32 %v235_v19, %v236_v54  ;;  %v298_v30 = vrot.slane %v703_v8, 3  ;;  %v301_v31 = vrot.slane %v703_v8, 4  ;;  %v304_v32 = vrot.slane %v703_v8, 5 }
  0x27   : > { %v250_v33 = vmax.f32 %v247_v22, %v248_v62  ;;  %v259_v34 = vmax.f32 %v258_v23, %v245_v61  ;;  %v285_v35 = vmax.f32 %v282_v24, %v283_v17  ;;  %v308_v36 = vrot.slane %v703_v8, 1 }
  0x28   : > { %535 = vst.msk [vmem:[%s700_s17 + $0x4] sm:$0x1] %vm181_vm0, %v238_v29  ;;  %v311_v37 = vrot.slane %v703_v8, 2  ;;  %v333_v38 = vmax.f32 %v328_v9, %v555_v26  ;;  %v324_v39 = vmax.f32 %v545_v5, %v552_v27  ;;  %v379_v41 = vmax.f32 %v555_v26, %v562_v28 }
  0x29   : > { %536 = vst.msk [vmem:[%s700_s17] sm:$0x20] %vm193_vm1, %v250_v33  ;;  %v260_v42 = vmax.f32 %v259_v34, %v248_v62  ;;  %v288_v43 = vmax.f32 %v285_v35, %v286_v20  ;;  %v300_v44 = vmax.f32 %v285_v35, %v298_v30  ;;  %v310_v45 = vmax.f32 %v703_v8, %v308_v36 }
  0x2a   : > { %v336_v49 = vrot.slane %v333_v38, 1  ;;  %v339_v50 = vrot.slane %v333_v38, 2  ;;  %v342_v54 = vrot.slane %v333_v38, 3  ;;  %v329_v57 = vmax.f32 %v324_v39, %v554_v40 }
  0x2b   : > { %537 = vst.msk [vmem:[%s700_s17 + $0x4] sm:$0x4] %vm204_vm2, %v260_v42  ;;  %v291_v51 = vmax.f32 %v288_v43, %v289_v21  ;;  %v303_v52 = vmax.f32 %v300_v44, %v301_v31  ;;  %v313_v53 = vmax.f32 %v310_v45, %v311_v37  ;;  %v384_v58 = vmax.f32 %v379_v41, %v564_v47 }
  0x2c   : > { %v338_v56 = vmax.f32 %v333_v38, %v336_v49  ;;  %v380_v59 = vmax.f32 %v556_v46, %v563_v48  ;;  %v345_v1 = vrot.slane %v333_v38, 4  ;;  %v334_v2 = vmax.f32 %v329_v57, %v556_v46 }
  0x2d   : > { %v294_v60 = vmax.f32 %v291_v51, %v292_v25  ;;  %v306_v61 = vmax.f32 %v303_v52, %v304_v32  ;;  %v314_v62 = vmax.f32 %v313_v53, %v298_v30  ;;  %v389_v3 = vmax.f32 %v384_v58, %v566_v55 }
  0x2e   : > { %v341_v0 = vmax.f32 %v338_v56, %v339_v50  ;;  %v348_v5 = vrot.slane %v333_v38, 5  ;;  %v354_v7 = vrot.slane %v334_v2, 3  ;;  %v357_v8 = vrot.slane %v334_v2, 4 }
  0x2f   : > { %546 = vst.msk [vmem:[%s700_s17 + $0x8] sm:$0x1] %vm181_vm0, %v294_v60  ;;  %v315_v4 = vmax.f32 %v314_v62, %v301_v31  ;;  %v385_v9 = vmax.f32 %v380_v59, %v565_v63  ;;  %v364_v11 = vrot.slane %v334_v2, 1  ;;  %v367_v12 = vrot.slane %v334_v2, 2 }
  0x30   : > { %547 = vst.msk [vmem:[%s700_s17 + $0x4] sm:$0x20] %vm193_vm1, %v306_v61  ;;  %v344_v6 = vmax.f32 %v341_v0, %v342_v54  ;;  %v392_v13 = vrot.slane %v389_v3, 1  ;;  %v356_v16 = vmax.f32 %v341_v0, %v354_v7  ;;  %v360_v17 = vrot.slane %v334_v2, 5 }
  0x31   : > { %v316_v10 = vmax.f32 %v315_v4, %v304_v32  ;;  %v395_v18 = vrot.slane %v389_v3, 2  ;;  %v366_v19 = vmax.f32 %v334_v2, %v364_v11  ;;  %v398_v21 = vrot.slane %v389_v3, 3 }
  0x32   : > { %v347_v15 = vmax.f32 %v344_v6, %v345_v1  ;;  %v394_v20 = vmax.f32 %v389_v3, %v392_v13  ;;  %v359_v23 = vmax.f32 %v356_v16, %v357_v8  ;;  %v390_v24 = vmax.f32 %v385_v9, %v567_v14 }
  0x33   : > { %548 = vst.msk [vmem:[%s700_s17 + $0x8] sm:$0x4] %vm204_vm2, %v316_v10  ;;  %v369_v25 = vmax.f32 %v366_v19, %v367_v12  ;;  %v401_v27 = vrot.slane %v389_v3, 4  ;;  %v404_v29 = vrot.slane %v389_v3, 5 }
  0x34   : > { %v350_v22 = vmax.f32 %v347_v15, %v348_v5  ;;  %v397_v26 = vmax.f32 %v394_v20, %v395_v18  ;;  %v362_v28 = vmax.f32 %v359_v23, %v360_v17  ;;  %v410_v30 = vrot.slane %v390_v24, 3 }
  0x35   : > { %v413_v31 = vrot.slane %v390_v24, 4  ;;  %v370_v32 = vmax.f32 %v369_v25, %v354_v7  ;;  %v420_v34 = vrot.slane %v390_v24, 1  ;;  %v423_v35 = vrot.slane %v390_v24, 2 }
  0x36   : > { %557 = vst.msk [vmem:[%s700_s17 + $0xc] sm:$0x1] %vm181_vm0, %v350_v22  ;;  %v400_v33 = vmax.f32 %v397_v26, %v398_v21  ;;  %v412_v36 = vmax.f32 %v397_v26, %v410_v30  ;;  %v416_v37 = vrot.slane %v390_v24, 5 }
  0x37   : > { %558 = vst.msk [vmem:[%s700_s17 + $0x8] sm:$0x20] %vm193_vm1, %v362_v28  ;;  %v371_v38 = vmax.f32 %v370_v32, %v357_v8  ;;  %v422_v40 = vmax.f32 %v390_v24, %v420_v34 }
  0x38   : > { %v403_v39 = vmax.f32 %v400_v33, %v401_v27  ;;  %v415_v41 = vmax.f32 %v412_v36, %v413_v31 }
  0x39   : > { %v372_v42 = vmax.f32 %v371_v38, %v360_v17  ;;  %v425_v44 = vmax.f32 %v422_v40, %v423_v35 }
  0x3a   : > { %v406_v43 = vmax.f32 %v403_v39, %v404_v29  ;;  %v418_v45 = vmax.f32 %v415_v41, %v416_v37 }
  0x3b   : > { %559 = vst.msk [vmem:[%s700_s17 + $0xc] sm:$0x4] %vm204_vm2, %v372_v42  ;;  %v426_v46 = vmax.f32 %v425_v44, %v410_v30 }
  0x3c   : > { %568 = vst.msk [vmem:[%s700_s17 + $0x10] sm:$0x1] %vm181_vm0, %v406_v43 }
  0x3d   : > { %569 = vst.msk [vmem:[%s700_s17 + $0xc] sm:$0x20] %vm193_vm1, %v418_v45  ;;  %v427_v47 = vmax.f32 %v426_v46, %v413_v31 }
  0x3f   : > { %v428_v48 = vmax.f32 %v427_v47, %v416_v37 }
  0x41   : > { %570 = vst.msk [vmem:[%s700_s17 + $0x10] sm:$0x4] %vm204_vm2, %v428_v48 }
  0x42 PF: > { %s11_s8 = sadd.s32 1, %s621_s8   ;;  %s762_s6 = smov %s617_s7 }
  0x43   : > { %p8_p5 = scmp.ge.s32.totalorder %s11_s8, 4   ;;  %s763_s7 = smov %s765_s9 }
  0x45   :  { %10 = sbr.rel (!%p8_p5) target bundleno = 2 (0x2), region = 73 }

</bundles_post_ra>
